<compile_context>
chip_gen: v6e
topology: v6e:2x2x1
jax: 0.10.0
libtpu: 0.0.40
codegen_flags: <defaults>
</compile_context>

<pallas_src>
import math

import jax
import jax.numpy as jnp
from jax.experimental import pallas as pl
from jax.experimental.pallas import tpu as pltpu


def _vmem_capacity_bytes():
    """Physical VMEM per TensorCore; conservative (v7x) fallback if unqueryable."""
    try:
        cap = getattr(pltpu.get_tpu_info(), "vmem_capacity_bytes", None)
        if cap:
            return int(cap)
    except Exception:
        pass
    return 64 << 20


def _fold_factor(H, W):
    """Rows folded into the lane axis so the lane dim is 128-dense when W < 128."""
    if W >= 128 or 128 % W != 0:
        return 1
    f = 128 // W
    while f > 1 and H % f != 0:
        f //= 2
    return f


def _pick_row_tile(HF, LW, budget_bytes, max_rows=None):
    """Largest row tile TH dividing HF that is a multiple of 8 (or HF) and fits budget."""
    cands = [th for th in range(HF, 0, -1)
             if HF % th == 0 and (th % 8 == 0 or th == HF)]
    if max_rows is not None:
        capped = [th for th in cands if th <= max_rows]
        if capped:
            cands = capped
    for th in cands:
        # ~12 live (TH, LW) f32 planes in the hot loop (p, coords, c, dmin,
        # per-GT temporaries, double-buffered input tile).
        if 12 * th * LW * 4 <= budget_bytes:
            return th
    return cands[-1]


def _approx_recip(x, newton_iters):
    """EUP approx reciprocal + Newton refinement (2 VPU ops per step)."""
    inv = pl.reciprocal(x, approx=True)
    for _ in range(newton_iters):
        inv = inv * (2.0 - x * inv)
    return inv


def _neg_int_pow(x, n, newton_iters):
    """x ** (-n) for positive integer n: approx reciprocal + square-and-multiply."""
    base = _approx_recip(x, newton_iters)
    acc = None
    while n:
        if n & 1:
            acc = base if acc is None else acc * base
        n >>= 1
        if n:
            base = base * base
    return acc


def _fold_rows(x, sb):
    """Reduce (TH, LW) -> (sb, LW) with pure VPU vreg adds (no XLU reduce)."""
    th, lw = x.shape
    if th == sb:
        return x
    return jnp.sum(x.reshape(th // sb, sb, lw), axis=0)


def make_whd(H, W, NG, p_exp=-9.0, max_row_tile=None, core_split=None,
             newton_iters=1):
    """Builds a Weighted-Hausdorff-Distance fn for fixed H, W, NG."""
    NP = H * W
    MAX_DIST = math.sqrt(H * H + W * W)
    P = float(p_exp)
    P_NEG_INT = (P < 0.0) and (P == int(P))

    F = _fold_factor(H, W)                 # rows folded into the lane axis
    HF, LW = H // F, F * W                 # lane-dense pixel layout: (HF, LW)
    W_SHIFT = int(math.log2(W)) if F > 1 else 0

    VMEM_CAP = _vmem_capacity_bytes()      # 64 MiB on v7x, 128 MiB on v5e/v6e
    TH = _pick_row_tile(HF, LW, max(4 << 20, VMEM_CAP // 4), max_row_tile)
    SB = 8 if TH % 8 == 0 else TH          # sublane height of the VMEM accumulators
    NT = HF // TH                          # row tiles per image

    if core_split is None:                 # keep both v7x TCs busy when B is 1/odd
        core_split = 2 if (NT % 2 == 0 and NT >= 2) else 1
    CS = core_split
    assert NT % CS == 0
    NT_PER = NT // CS

    VMEM_LIMIT = int(min((VMEM_CAP * 3) // 4, 100 << 20))

    def kernel(sizes_ref, gty_ref, gtx_ref, prob_ref,
               num_ref, den_ref, pow_ref,
               num_sc, den_sc, pow_sc):
        b = pl.program_id(0)
        cs = pl.program_id(1)
        t = pl.program_id(2)

        @pl.when(t == 0)
        def _():
            num_sc[...] = jnp.zeros_like(num_sc)
            den_sc[...] = jnp.zeros_like(den_sc)
            pow_sc[...] = jnp.zeros_like(pow_sc)

        # per-batch normalization factors (orig_size / resized_size), SMEM scalars
        hs = sizes_ref[b, 0] * jnp.float32(1.0 / H)
        ws = sizes_ref[b, 1] * jnp.float32(1.0 / W)

        p = prob_ref[...]                                    # (TH, LW) lane-dense

        # pixel coordinates from in-kernel iota: nothing streamed from HBM
        row_i = jax.lax.broadcasted_iota(jnp.int32, (TH, LW), 0)
        lane_i = jax.lax.broadcasted_iota(jnp.int32, (TH, LW), 1)
        base = (cs * NT_PER + t) * TH                        # folded-row offset of tile
        if F > 1:                                            # W | 128 -> W is a power of 2
            ix_i = lane_i & (W - 1)
            iy_i = (base + row_i) * F + (lane_i >> W_SHIFT)
        else:
            ix_i = lane_i
            iy_i = base + row_i
        iy = iy_i.astype(jnp.float32) * hs
        ix = ix_i.astype(jnp.float32) * ws

        # NG-independent part of wd, hoisted out of the GT loop
        c = (1.0 - p) * jnp.float32(MAX_DIST) + jnp.float32(1e-6)

        # GT loop: only (TH, LW)-sized values live; no (NG, TH, LW) intermediates.
        # NG is a small static constant, so the fully unrolled Python loop is
        # equivalent to lax.fori_loop(..., unroll=True).
        dmin = jnp.full((TH, LW), jnp.inf, dtype=jnp.float32)
        for g in range(NG):
            gy = gty_ref[b, g] * hs                          # SMEM scalar -> splat
            gx = gtx_ref[b, g] * ws
            dy = iy - gy
            dx = ix - gx
            d = jnp.sqrt(dy * dy + dx * dx)
            dmin = jnp.minimum(dmin, d)
            wd_eps = c + p * d                               # (wd + eps)
            if P_NEG_INT:
                powed = _neg_int_pow(wd_eps, -int(P), newton_iters)
            else:
                powed = jnp.exp(jnp.float32(P) * jnp.log(wd_eps))
            # TODO(synk): a max-factored soft-min would avoid f32 overflow when
            # p == 1 exactly at a GT pixel; matches the f32 reference as-is.
            pow_sc[g, :, :] = pow_sc[g, :, :] + _fold_rows(powed, SB)

        # term-1 partials: deferred reductions, pure VPU adds into (SB, LW) accs
        den_sc[...] = den_sc[...] + _fold_rows(p, SB)
        num_sc[...] = num_sc[...] + _fold_rows(p * dmin, SB)

        # finalize once per (batch, core-split): the only cross-lane XLU reduces
        @pl.when(t == NT_PER - 1)
        def _():
            num_ref[...] = jnp.sum(num_sc[...], keepdims=True).reshape(1, 1, 1, 1)
            den_ref[...] = jnp.sum(den_sc[...], keepdims=True).reshape(1, 1, 1, 1)
            pw = jnp.sum(jnp.sum(pow_sc[...], axis=2, keepdims=True),
                         axis=1, keepdims=True)              # (NG, 1, 1)
            pow_ref[...] = pw.reshape(1, 1, NG, 1)

    def whd(prob_map, gt, orig_sizes):
        """prob_map: (B,H,W) f32 in [0,1]; gt: (B,NG,2) f32 (y,x); orig_sizes: (B,2) f32."""
        B = prob_map.shape[0]
        assert prob_map.shape[1:] == (H, W)
        assert gt.shape[1:] == (NG, 2)
        prob = prob_map.astype(jnp.float32).reshape(B, HF, LW)   # lane-dense fold
        gty = gt[:, :, 0].astype(jnp.float32)                    # (B, NG) -> SMEM
        gtx = gt[:, :, 1].astype(jnp.float32)                    # (B, NG) -> SMEM
        sizes = orig_sizes.astype(jnp.float32)                   # (B, 2)  -> SMEM

        num_o, den_o, pow_o = pl.pallas_call(
            kernel,
            grid=(B, CS, NT_PER),
            in_specs=[
                pl.BlockSpec(memory_space=pltpu.MemorySpace.SMEM),    # orig_sizes
                pl.BlockSpec(memory_space=pltpu.MemorySpace.SMEM),    # gt_y
                pl.BlockSpec(memory_space=pltpu.MemorySpace.SMEM),    # gt_x
                pl.BlockSpec((pl.Squeezed(), TH, LW),
                             lambda b, cs, t: (b, cs * NT_PER + t, 0)),  # prob_map
            ],
            out_specs=[
                pl.BlockSpec((1, 1, 1, 1), lambda b, cs, t: (b, cs, 0, 0)),
                pl.BlockSpec((1, 1, 1, 1), lambda b, cs, t: (b, cs, 0, 0)),
                pl.BlockSpec((1, 1, NG, 1), lambda b, cs, t: (b, cs, 0, 0)),
            ],
            out_shape=[
                jax.ShapeDtypeStruct((B, CS, 1, 1), jnp.float32),   # sum p*min_d
                jax.ShapeDtypeStruct((B, CS, 1, 1), jnp.float32),   # sum p
                jax.ShapeDtypeStruct((B, CS, NG, 1), jnp.float32),  # per-GT sum (wd+eps)^P
            ],
            scratch_shapes=[
                pltpu.VMEM((SB, LW), jnp.float32),      # sum(p * min_over_gt(d)) partial
                pltpu.VMEM((SB, LW), jnp.float32),      # sum(p) partial
                pltpu.VMEM((NG, SB, LW), jnp.float32),  # per-GT (wd+eps)^P partial
            ],
            compiler_params=pltpu.CompilerParams(
                dimension_semantics=("parallel", "parallel", "arbitrary"),
                vmem_limit_bytes=VMEM_LIMIT),
        )(sizes, gty, gtx, prob)

        # tiny JAX epilogue combining per-(batch, core-split) partial sums
        num_b = jnp.sum(num_o[:, :, 0, 0], axis=1)               # (B,)
        den_b = jnp.sum(den_o[:, :, 0, 0], axis=1)               # (B,)
        pow_b = jnp.sum(pow_o[:, :, :, 0], axis=1)               # (B, NG)
        term1 = num_b / (den_b + 1e-6)
        gm = (pow_b * (1.0 / NP)) ** (1.0 / P)                   # generalized mean
        term2 = jnp.mean(gm, axis=1)
        # TODO(synk): the PyTorch early-exit for degenerate/padded GT rows is not
        # handled; gt is assumed to hold exactly NG valid (y, x) points per item.
        return jnp.mean(term1) + jnp.mean(term2)

    return whd


def whd_reference(prob_map, gt, orig_sizes, H, W, p_exp=-9.0):
    """Pure-JAX reference mirroring the PyTorch forward (for verification)."""
    B = prob_map.shape[0]
    max_dist = math.sqrt(H * H + W * W)
    ii, jj = jnp.meshgrid(jnp.arange(H), jnp.arange(W), indexing="ij")
    locs = jnp.stack([ii.ravel(), jj.ravel()], axis=-1).astype(jnp.float32)  # (NP,2)
    t1s, t2s = [], []
    for b in range(B):
        norm = orig_sizes[b] / jnp.array([H, W], jnp.float32)       # (2,)
        nx = locs * norm                                            # (NP, 2)
        ny = gt[b] * norm                                           # (NG, 2)
        d = jnp.sqrt(jnp.sum((nx[:, None, :] - ny[None, :, :]) ** 2, -1))  # (NP, NG)
        p = prob_map[b].ravel()
        n_est = jnp.sum(p)
        t1 = jnp.sum(p * jnp.min(d, axis=1)) / (n_est + 1e-6)
        wd = (1.0 - p[:, None]) * max_dist + p[:, None] * d         # (NP, NG)
        minn = jnp.mean((wd + 1e-6) ** p_exp, axis=0) ** (1.0 / p_exp)
        t2 = jnp.mean(minn)
        t1s.append(t1)
        t2s.append(t2)
    return jnp.mean(jnp.stack(t1s)) + jnp.mean(jnp.stack(t2s))


if __name__ == "__main__":
    key = jax.random.PRNGKey(0)

    def run_case(B, H, W, NG, orig_sizes, max_row_tile=None):
        k1, k2, k3 = jax.random.split(jax.random.fold_in(key, H * W + NG), 3)
        prob_map = jax.random.uniform(k1, (B, H, W), dtype=jnp.float32)
        gt_y = jax.random.uniform(k2, (B, NG), minval=0.0, maxval=float(H))
        gt_x = jax.random.uniform(k3, (B, NG), minval=0.0, maxval=float(W))
        gt = jnp.stack([gt_y, gt_x], axis=-1).astype(jnp.float32)
        whd = make_whd(H, W, NG, max_row_tile=max_row_tile)
        out = jax.block_until_ready(whd(prob_map, gt, orig_sizes))
        ref = whd_reference(prob_map, gt, orig_sizes, H, W)
        assert jnp.allclose(out, ref, rtol=1e-2, atol=1e-3), (out, ref)

    # canonical small shape: 16x16 folds to a single (2, 128) lane-dense tile
    run_case(2, 16, 16, 8,
             jnp.array([[32.0, 48.0], [64.0, 64.0]], jnp.float32))
    # multi-tile accumulation + sublane fold + core-split epilogue (B=1 path)
    run_case(1, 256, 32, 5,
             jnp.array([[300.0, 77.0]], jnp.float32), max_row_tile=16)

    print("KERNEL_OK")
</pallas_src>

<mosaic_0001>
module attributes {stable_mosaic.version = 11 : i64} {
  func.func @kernel(%arg0: i32, %arg1: i32, %arg2: i32, %arg3: memref<2x2xf32, #tpu.memory_space<smem>>, %arg4: memref<2x8xf32, #tpu.memory_space<smem>>, %arg5: memref<2x8xf32, #tpu.memory_space<smem>>, %arg6: memref<1x2x128xf32, #tpu.memory_space<vmem>>, %arg7: memref<1x1x1x1xf32, #tpu.memory_space<vmem>>, %arg8: memref<1x1x1x1xf32, #tpu.memory_space<vmem>>, %arg9: memref<1x1x8x1xf32, #tpu.memory_space<vmem>>, %arg10: memref<2x128xf32, #tpu.memory_space<vmem>>, %arg11: memref<2x128xf32, #tpu.memory_space<vmem>>, %arg12: memref<8x2x128xf32, #tpu.memory_space<vmem>>) attributes {dimension_semantics = [#tpu.dimension_semantics<parallel>, #tpu.dimension_semantics<parallel>, #tpu.dimension_semantics<arbitrary>], iteration_bounds = array<i64: 2, 1, 1>, scalar_prefetch = 0 : i64, scratch_operands = 3 : i64, tpu.core_type = #tpu.core_type<tc>, window_params = [{transform_indices = @transform_0, window_bounds = array<i64: 2, 2>}, {transform_indices = @transform_1, window_bounds = array<i64: 2, 8>}, {transform_indices = @transform_2, window_bounds = array<i64: 2, 8>}, {transform_indices = @transform_3, window_bounds = array<i64: 1, 2, 128>}, {transform_indices = @transform_4, window_bounds = array<i64: 1, 1, 1, 1>}, {transform_indices = @transform_5, window_bounds = array<i64: 1, 1, 1, 1>}, {transform_indices = @transform_6, window_bounds = array<i64: 1, 1, 8, 1>}]} {
    %c0_i32 = arith.constant 0 : i32
    %0 = arith.cmpi eq, %arg2, %c0_i32 : i32
    %1 = arith.extui %0 : i1 to i32
    %c0_i32_0 = arith.constant 0 : i32
    %2 = arith.cmpi ne, %1, %c0_i32_0 : i32
    scf.if %2 {
      %cst_85 = arith.constant 0.000000e+00 : f32
      %304 = vector.broadcast %cst_85 : f32 to vector<2x128xf32>
      %c0_86 = arith.constant 0 : index
      %c0_87 = arith.constant 0 : index
      %305 = vector.load %arg10[%c0_86, %c0_87] : memref<2x128xf32, #tpu.memory_space<vmem>>, vector<2x128xf32>
      tpu.vector_store %arg10[%c0_86, %c0_87], %304 {strides = array<i32>} : memref<2x128xf32, #tpu.memory_space<vmem>>, vector<2x128xf32>,
      %cst_88 = arith.constant 0.000000e+00 : f32
      %306 = vector.broadcast %cst_88 : f32 to vector<2x128xf32>
      %c0_89 = arith.constant 0 : index
      %c0_90 = arith.constant 0 : index
      %307 = vector.load %arg11[%c0_89, %c0_90] : memref<2x128xf32, #tpu.memory_space<vmem>>, vector<2x128xf32>
      tpu.vector_store %arg11[%c0_89, %c0_90], %306 {strides = array<i32>} : memref<2x128xf32, #tpu.memory_space<vmem>>, vector<2x128xf32>,
      %cst_91 = arith.constant 0.000000e+00 : f32
      %308 = vector.broadcast %cst_91 : f32 to vector<8x2x128xf32>
      %c0_92 = arith.constant 0 : index
      %c0_93 = arith.constant 0 : index
      %c0_94 = arith.constant 0 : index
      %309 = vector.load %arg12[%c0_92, %c0_93, %c0_94] : memref<8x2x128xf32, #tpu.memory_space<vmem>>, vector<8x2x128xf32>
      tpu.vector_store %arg12[%c0_92, %c0_93, %c0_94], %308 {strides = array<i32>} : memref<8x2x128xf32, #tpu.memory_space<vmem>>, vector<8x2x128xf32>,
    } else {
    }
    %3 = arith.index_cast %arg0 : i32 to index
    %c0 = arith.constant 0 : index
    %4 = memref.load %arg3[%3, %c0] : memref<2x2xf32, #tpu.memory_space<smem>>
    %cst = arith.constant 6.250000e-02 : f32
    %5 = arith.mulf %4, %cst : f32
    %6 = arith.index_cast %arg0 : i32 to index
    %c1 = arith.constant 1 : index
    %7 = memref.load %arg3[%6, %c1] : memref<2x2xf32, #tpu.memory_space<smem>>
    %cst_1 = arith.constant 6.250000e-02 : f32
    %8 = arith.mulf %7, %cst_1 : f32
    %c0_2 = arith.constant 0 : index
    %c0_3 = arith.constant 0 : index
    %c0_4 = arith.constant 0 : index
    %9 = vector.load %arg6[%c0_2, %c0_3, %c0_4] : memref<1x2x128xf32, #tpu.memory_space<vmem>>, vector<1x2x128xf32>
    %10 = vector.shape_cast %9 : vector<1x2x128xf32> to vector<2x128xf32>
    %11 = tpu.iota {dimensions = array<i32: 0>} : vector<2x128xi32>
    %12 = tpu.iota {dimensions = array<i32: 1>} : vector<2x128xi32>
    %c1_i32 = arith.constant 1 : i32
    %13 = arith.muli %arg1, %c1_i32 : i32
    %14 = arith.addi %13, %arg2 : i32
    %c2_i32 = arith.constant 2 : i32
    %15 = arith.muli %14, %c2_i32 : i32
    %c15_i32 = arith.constant 15 : i32
    %16 = vector.broadcast %c15_i32 : i32 to vector<2x128xi32>
    %17 = arith.andi %12, %16 : vector<2x128xi32>
    %18 = vector.broadcast %15 : i32 to vector<2x128xi32>
    %19 = arith.addi %18, %11 : vector<2x128xi32>
    %c8_i32 = arith.constant 8 : i32
    %20 = vector.broadcast %c8_i32 : i32 to vector<2x128xi32>
    %21 = arith.muli %19, %20 : vector<2x128xi32>
    %c4_i32 = arith.constant 4 : i32
    %22 = vector.broadcast %c4_i32 : i32 to vector<2x128xi32>
    %23 = arith.shrsi %12, %22 : vector<2x128xi32>
    %24 = arith.addi %21, %23 : vector<2x128xi32>
    %25 = arith.sitofp %24 : vector<2x128xi32> to vector<2x128xf32>
    %26 = vector.broadcast %5 : f32 to vector<2x128xf32>
    %27 = arith.mulf %25, %26 : vector<2x128xf32>
    %28 = arith.sitofp %17 : vector<2x128xi32> to vector<2x128xf32>
    %29 = vector.broadcast %8 : f32 to vector<2x128xf32>
    %30 = arith.mulf %28, %29 : vector<2x128xf32>
    %cst_5 = arith.constant 1.000000e+00 : f32
    %31 = vector.broadcast %cst_5 : f32 to vector<2x128xf32>
    %32 = arith.subf %31, %10 : vector<2x128xf32>
    %cst_6 = arith.constant 22.6274166 : f32
    %33 = vector.broadcast %cst_6 : f32 to vector<2x128xf32>
    %34 = arith.mulf %32, %33 : vector<2x128xf32>
    %cst_7 = arith.constant 9.99999997E-7 : f32
    %35 = vector.broadcast %cst_7 : f32 to vector<2x128xf32>
    %36 = arith.addf %34, %35 : vector<2x128xf32>
    %cst_8 = arith.constant 0x7F800000 : f32
    %37 = vector.broadcast %cst_8 : f32 to vector<2x128xf32>
    %38 = arith.index_cast %arg0 : i32 to index
    %c0_9 = arith.constant 0 : index
    %39 = memref.load %arg4[%38, %c0_9] : memref<2x8xf32, #tpu.memory_space<smem>>
    %40 = arith.mulf %39, %5 : f32
    %41 = arith.index_cast %arg0 : i32 to index
    %c0_10 = arith.constant 0 : index
    %42 = memref.load %arg5[%41, %c0_10] : memref<2x8xf32, #tpu.memory_space<smem>>
    %43 = arith.mulf %42, %8 : f32
    %44 = vector.broadcast %40 : f32 to vector<2x128xf32>
    %45 = arith.subf %27, %44 : vector<2x128xf32>
    %46 = vector.broadcast %43 : f32 to vector<2x128xf32>
    %47 = arith.subf %30, %46 : vector<2x128xf32>
    %48 = arith.mulf %45, %45 : vector<2x128xf32>
    %49 = arith.mulf %47, %47 : vector<2x128xf32>
    %50 = arith.addf %48, %49 : vector<2x128xf32>
    %51 = math.sqrt %50 : vector<2x128xf32>
    %52 = arith.minimumf %37, %51 : vector<2x128xf32>
    %53 = arith.mulf %10, %51 : vector<2x128xf32>
    %54 = arith.addf %36, %53 : vector<2x128xf32>
    %55 = tpu.reciprocal %54 {approx = true} : vector<2x128xf32> -> vector<2x128xf32>
    %56 = arith.mulf %54, %55 : vector<2x128xf32>
    %cst_11 = arith.constant 2.000000e+00 : f32
    %57 = vector.broadcast %cst_11 : f32 to vector<2x128xf32>
    %58 = arith.subf %57, %56 : vector<2x128xf32>
    %59 = arith.mulf %55, %58 : vector<2x128xf32>
    %60 = arith.mulf %59, %59 : vector<2x128xf32>
    %61 = arith.mulf %60, %60 : vector<2x128xf32>
    %62 = arith.mulf %61, %61 : vector<2x128xf32>
    %63 = arith.mulf %59, %62 : vector<2x128xf32>
    %c0_12 = arith.constant 0 : index
    %c0_13 = arith.constant 0 : index
    %c0_14 = arith.constant 0 : index
    %64 = vector.load %arg12[%c0_12, %c0_13, %c0_14] : memref<8x2x128xf32, #tpu.memory_space<vmem>>, vector<1x2x128xf32>
    %65 = vector.shape_cast %64 : vector<1x2x128xf32> to vector<2x128xf32>
    %66 = arith.addf %65, %63 : vector<2x128xf32>
    %c0_15 = arith.constant 0 : index
    %c0_16 = arith.constant 0 : index
    %c0_17 = arith.constant 0 : index
    %67 = vector.load %arg12[%c0_15, %c0_16, %c0_17] : memref<8x2x128xf32, #tpu.memory_space<vmem>>, vector<1x2x128xf32>
    %68 = vector.shape_cast %67 : vector<1x2x128xf32> to vector<2x128xf32>
    %69 = vector.shape_cast %66 : vector<2x128xf32> to vector<1x2x128xf32>
    tpu.vector_store %arg12[%c0_15, %c0_16, %c0_17], %69 {strides = array<i32>} : memref<8x2x128xf32, #tpu.memory_space<vmem>>, vector<1x2x128xf32>,
    %70 = arith.index_cast %arg0 : i32 to index
    %c1_18 = arith.constant 1 : index
    %71 = memref.load %arg4[%70, %c1_18] : memref<2x8xf32, #tpu.memory_space<smem>>
    %72 = arith.mulf %71, %5 : f32
    %73 = arith.index_cast %arg0 : i32 to index
    %c1_19 = arith.constant 1 : index
    %74 = memref.load %arg5[%73, %c1_19] : memref<2x8xf32, #tpu.memory_space<smem>>
    %75 = arith.mulf %74, %8 : f32
    %76 = vector.broadcast %72 : f32 to vector<2x128xf32>
    %77 = arith.subf %27, %76 : vector<2x128xf32>
    %78 = vector.broadcast %75 : f32 to vector<2x128xf32>
    %79 = arith.subf %30, %78 : vector<2x128xf32>
    %80 = arith.mulf %77, %77 : vector<2x128xf32>
    %81 = arith.mulf %79, %79 : vector<2x128xf32>
    %82 = arith.addf %80, %81 : vector<2x128xf32>
    %83 = math.sqrt %82 : vector<2x128xf32>
    %84 = arith.minimumf %52, %83 : vector<2x128xf32>
    %85 = arith.mulf %10, %83 : vector<2x128xf32>
    %86 = arith.addf %36, %85 : vector<2x128xf32>
    %87 = tpu.reciprocal %86 {approx = true} : vector<2x128xf32> -> vector<2x128xf32>
    %88 = arith.mulf %86, %87 : vector<2x128xf32>
    %cst_20 = arith.constant 2.000000e+00 : f32
    %89 = vector.broadcast %cst_20 : f32 to vector<2x128xf32>
    %90 = arith.subf %89, %88 : vector<2x128xf32>
    %91 = arith.mulf %87, %90 : vector<2x128xf32>
    %92 = arith.mulf %91, %91 : vector<2x128xf32>
    %93 = arith.mulf %92, %92 : vector<2x128xf32>
    %94 = arith.mulf %93, %93 : vector<2x128xf32>
    %95 = arith.mulf %91, %94 : vector<2x128xf32>
    %c1_21 = arith.constant 1 : index
    %c0_22 = arith.constant 0 : index
    %c0_23 = arith.constant 0 : index
    %96 = vector.load %arg12[%c1_21, %c0_22, %c0_23] : memref<8x2x128xf32, #tpu.memory_space<vmem>>, vector<1x2x128xf32>
    %97 = vector.shape_cast %96 : vector<1x2x128xf32> to vector<2x128xf32>
    %98 = arith.addf %97, %95 : vector<2x128xf32>
    %c1_24 = arith.constant 1 : index
    %c0_25 = arith.constant 0 : index
    %c0_26 = arith.constant 0 : index
    %99 = vector.load %arg12[%c1_24, %c0_25, %c0_26] : memref<8x2x128xf32, #tpu.memory_space<vmem>>, vector<1x2x128xf32>
    %100 = vector.shape_cast %99 : vector<1x2x128xf32> to vector<2x128xf32>
    %101 = vector.shape_cast %98 : vector<2x128xf32> to vector<1x2x128xf32>
    tpu.vector_store %arg12[%c1_24, %c0_25, %c0_26], %101 {strides = array<i32>} : memref<8x2x128xf32, #tpu.memory_space<vmem>>, vector<1x2x128xf32>,
    %102 = arith.index_cast %arg0 : i32 to index
    %c2 = arith.constant 2 : index
    %103 = memref.load %arg4[%102, %c2] : memref<2x8xf32, #tpu.memory_space<smem>>
    %104 = arith.mulf %103, %5 : f32
    %105 = arith.index_cast %arg0 : i32 to index
    %c2_27 = arith.constant 2 : index
    %106 = memref.load %arg5[%105, %c2_27] : memref<2x8xf32, #tpu.memory_space<smem>>
    %107 = arith.mulf %106, %8 : f32
    %108 = vector.broadcast %104 : f32 to vector<2x128xf32>
    %109 = arith.subf %27, %108 : vector<2x128xf32>
    %110 = vector.broadcast %107 : f32 to vector<2x128xf32>
    %111 = arith.subf %30, %110 : vector<2x128xf32>
    %112 = arith.mulf %109, %109 : vector<2x128xf32>
    %113 = arith.mulf %111, %111 : vector<2x128xf32>
    %114 = arith.addf %112, %113 : vector<2x128xf32>
    %115 = math.sqrt %114 : vector<2x128xf32>
    %116 = arith.minimumf %84, %115 : vector<2x128xf32>
    %117 = arith.mulf %10, %115 : vector<2x128xf32>
    %118 = arith.addf %36, %117 : vector<2x128xf32>
    %119 = tpu.reciprocal %118 {approx = true} : vector<2x128xf32> -> vector<2x128xf32>
    %120 = arith.mulf %118, %119 : vector<2x128xf32>
    %cst_28 = arith.constant 2.000000e+00 : f32
    %121 = vector.broadcast %cst_28 : f32 to vector<2x128xf32>
    %122 = arith.subf %121, %120 : vector<2x128xf32>
    %123 = arith.mulf %119, %122 : vector<2x128xf32>
    %124 = arith.mulf %123, %123 : vector<2x128xf32>
    %125 = arith.mulf %124, %124 : vector<2x128xf32>
    %126 = arith.mulf %125, %125 : vector<2x128xf32>
    %127 = arith.mulf %123, %126 : vector<2x128xf32>
    %c2_29 = arith.constant 2 : index
    %c0_30 = arith.constant 0 : index
    %c0_31 = arith.constant 0 : index
    %128 = vector.load %arg12[%c2_29, %c0_30, %c0_31] : memref<8x2x128xf32, #tpu.memory_space<vmem>>, vector<1x2x128xf32>
    %129 = vector.shape_cast %128 : vector<1x2x128xf32> to vector<2x128xf32>
    %130 = arith.addf %129, %127 : vector<2x128xf32>
    %c2_32 = arith.constant 2 : index
    %c0_33 = arith.constant 0 : index
    %c0_34 = arith.constant 0 : index
    %131 = vector.load %arg12[%c2_32, %c0_33, %c0_34] : memref<8x2x128xf32, #tpu.memory_space<vmem>>, vector<1x2x128xf32>
    %132 = vector.shape_cast %131 : vector<1x2x128xf32> to vector<2x128xf32>
    %133 = vector.shape_cast %130 : vector<2x128xf32> to vector<1x2x128xf32>
    tpu.vector_store %arg12[%c2_32, %c0_33, %c0_34], %133 {strides = array<i32>} : memref<8x2x128xf32, #tpu.memory_space<vmem>>, vector<1x2x128xf32>,
    %134 = arith.index_cast %arg0 : i32 to index
    %c3 = arith.constant 3 : index
    %135 = memref.load %arg4[%134, %c3] : memref<2x8xf32, #tpu.memory_space<smem>>
    %136 = arith.mulf %135, %5 : f32
    %137 = arith.index_cast %arg0 : i32 to index
    %c3_35 = arith.constant 3 : index
    %138 = memref.load %arg5[%137, %c3_35] : memref<2x8xf32, #tpu.memory_space<smem>>
    %139 = arith.mulf %138, %8 : f32
    %140 = vector.broadcast %136 : f32 to vector<2x128xf32>
    %141 = arith.subf %27, %140 : vector<2x128xf32>
    %142 = vector.broadcast %139 : f32 to vector<2x128xf32>
    %143 = arith.subf %30, %142 : vector<2x128xf32>
    %144 = arith.mulf %141, %141 : vector<2x128xf32>
    %145 = arith.mulf %143, %143 : vector<2x128xf32>
    %146 = arith.addf %144, %145 : vector<2x128xf32>
    %147 = math.sqrt %146 : vector<2x128xf32>
    %148 = arith.minimumf %116, %147 : vector<2x128xf32>
    %149 = arith.mulf %10, %147 : vector<2x128xf32>
    %150 = arith.addf %36, %149 : vector<2x128xf32>
    %151 = tpu.reciprocal %150 {approx = true} : vector<2x128xf32> -> vector<2x128xf32>
    %152 = arith.mulf %150, %151 : vector<2x128xf32>
    %cst_36 = arith.constant 2.000000e+00 : f32
    %153 = vector.broadcast %cst_36 : f32 to vector<2x128xf32>
    %154 = arith.subf %153, %152 : vector<2x128xf32>
    %155 = arith.mulf %151, %154 : vector<2x128xf32>
    %156 = arith.mulf %155, %155 : vector<2x128xf32>
    %157 = arith.mulf %156, %156 : vector<2x128xf32>
    %158 = arith.mulf %157, %157 : vector<2x128xf32>
    %159 = arith.mulf %155, %158 : vector<2x128xf32>
    %c3_37 = arith.constant 3 : index
    %c0_38 = arith.constant 0 : index
    %c0_39 = arith.constant 0 : index
    %160 = vector.load %arg12[%c3_37, %c0_38, %c0_39] : memref<8x2x128xf32, #tpu.memory_space<vmem>>, vector<1x2x128xf32>
    %161 = vector.shape_cast %160 : vector<1x2x128xf32> to vector<2x128xf32>
    %162 = arith.addf %161, %159 : vector<2x128xf32>
    %c3_40 = arith.constant 3 : index
    %c0_41 = arith.constant 0 : index
    %c0_42 = arith.constant 0 : index
    %163 = vector.load %arg12[%c3_40, %c0_41, %c0_42] : memref<8x2x128xf32, #tpu.memory_space<vmem>>, vector<1x2x128xf32>
    %164 = vector.shape_cast %163 : vector<1x2x128xf32> to vector<2x128xf32>
    %165 = vector.shape_cast %162 : vector<2x128xf32> to vector<1x2x128xf32>
    tpu.vector_store %arg12[%c3_40, %c0_41, %c0_42], %165 {strides = array<i32>} : memref<8x2x128xf32, #tpu.memory_space<vmem>>, vector<1x2x128xf32>,
    %166 = arith.index_cast %arg0 : i32 to index
    %c4 = arith.constant 4 : index
    %167 = memref.load %arg4[%166, %c4] : memref<2x8xf32, #tpu.memory_space<smem>>
    %168 = arith.mulf %167, %5 : f32
    %169 = arith.index_cast %arg0 : i32 to index
    %c4_43 = arith.constant 4 : index
    %170 = memref.load %arg5[%169, %c4_43] : memref<2x8xf32, #tpu.memory_space<smem>>
    %171 = arith.mulf %170, %8 : f32
    %172 = vector.broadcast %168 : f32 to vector<2x128xf32>
    %173 = arith.subf %27, %172 : vector<2x128xf32>
    %174 = vector.broadcast %171 : f32 to vector<2x128xf32>
    %175 = arith.subf %30, %174 : vector<2x128xf32>
    %176 = arith.mulf %173, %173 : vector<2x128xf32>
    %177 = arith.mulf %175, %175 : vector<2x128xf32>
    %178 = arith.addf %176, %177 : vector<2x128xf32>
    %179 = math.sqrt %178 : vector<2x128xf32>
    %180 = arith.minimumf %148, %179 : vector<2x128xf32>
    %181 = arith.mulf %10, %179 : vector<2x128xf32>
    %182 = arith.addf %36, %181 : vector<2x128xf32>
    %183 = tpu.reciprocal %182 {approx = true} : vector<2x128xf32> -> vector<2x128xf32>
    %184 = arith.mulf %182, %183 : vector<2x128xf32>
    %cst_44 = arith.constant 2.000000e+00 : f32
    %185 = vector.broadcast %cst_44 : f32 to vector<2x128xf32>
    %186 = arith.subf %185, %184 : vector<2x128xf32>
    %187 = arith.mulf %183, %186 : vector<2x128xf32>
    %188 = arith.mulf %187, %187 : vector<2x128xf32>
    %189 = arith.mulf %188, %188 : vector<2x128xf32>
    %190 = arith.mulf %189, %189 : vector<2x128xf32>
    %191 = arith.mulf %187, %190 : vector<2x128xf32>
    %c4_45 = arith.constant 4 : index
    %c0_46 = arith.constant 0 : index
    %c0_47 = arith.constant 0 : index
    %192 = vector.load %arg12[%c4_45, %c0_46, %c0_47] : memref<8x2x128xf32, #tpu.memory_space<vmem>>, vector<1x2x128xf32>
    %193 = vector.shape_cast %192 : vector<1x2x128xf32> to vector<2x128xf32>
    %194 = arith.addf %193, %191 : vector<2x128xf32>
    %c4_48 = arith.constant 4 : index
    %c0_49 = arith.constant 0 : index
    %c0_50 = arith.constant 0 : index
    %195 = vector.load %arg12[%c4_48, %c0_49, %c0_50] : memref<8x2x128xf32, #tpu.memory_space<vmem>>, vector<1x2x128xf32>
    %196 = vector.shape_cast %195 : vector<1x2x128xf32> to vector<2x128xf32>
    %197 = vector.shape_cast %194 : vector<2x128xf32> to vector<1x2x128xf32>
    tpu.vector_store %arg12[%c4_48, %c0_49, %c0_50], %197 {strides = array<i32>} : memref<8x2x128xf32, #tpu.memory_space<vmem>>, vector<1x2x128xf32>,
    %198 = arith.index_cast %arg0 : i32 to index
    %c5 = arith.constant 5 : index
    %199 = memref.load %arg4[%198, %c5] : memref<2x8xf32, #tpu.memory_space<smem>>
    %200 = arith.mulf %199, %5 : f32
    %201 = arith.index_cast %arg0 : i32 to index
    %c5_51 = arith.constant 5 : index
    %202 = memref.load %arg5[%201, %c5_51] : memref<2x8xf32, #tpu.memory_space<smem>>
    %203 = arith.mulf %202, %8 : f32
    %204 = vector.broadcast %200 : f32 to vector<2x128xf32>
    %205 = arith.subf %27, %204 : vector<2x128xf32>
    %206 = vector.broadcast %203 : f32 to vector<2x128xf32>
    %207 = arith.subf %30, %206 : vector<2x128xf32>
    %208 = arith.mulf %205, %205 : vector<2x128xf32>
    %209 = arith.mulf %207, %207 : vector<2x128xf32>
    %210 = arith.addf %208, %209 : vector<2x128xf32>
    %211 = math.sqrt %210 : vector<2x128xf32>
    %212 = arith.minimumf %180, %211 : vector<2x128xf32>
    %213 = arith.mulf %10, %211 : vector<2x128xf32>
    %214 = arith.addf %36, %213 : vector<2x128xf32>
    %215 = tpu.reciprocal %214 {approx = true} : vector<2x128xf32> -> vector<2x128xf32>
    %216 = arith.mulf %214, %215 : vector<2x128xf32>
    %cst_52 = arith.constant 2.000000e+00 : f32
    %217 = vector.broadcast %cst_52 : f32 to vector<2x128xf32>
    %218 = arith.subf %217, %216 : vector<2x128xf32>
    %219 = arith.mulf %215, %218 : vector<2x128xf32>
    %220 = arith.mulf %219, %219 : vector<2x128xf32>
    %221 = arith.mulf %220, %220 : vector<2x128xf32>
    %222 = arith.mulf %221, %221 : vector<2x128xf32>
    %223 = arith.mulf %219, %222 : vector<2x128xf32>
    %c5_53 = arith.constant 5 : index
    %c0_54 = arith.constant 0 : index
    %c0_55 = arith.constant 0 : index
    %224 = vector.load %arg12[%c5_53, %c0_54, %c0_55] : memref<8x2x128xf32, #tpu.memory_space<vmem>>, vector<1x2x128xf32>
    %225 = vector.shape_cast %224 : vector<1x2x128xf32> to vector<2x128xf32>
    %226 = arith.addf %225, %223 : vector<2x128xf32>
    %c5_56 = arith.constant 5 : index
    %c0_57 = arith.constant 0 : index
    %c0_58 = arith.constant 0 : index
    %227 = vector.load %arg12[%c5_56, %c0_57, %c0_58] : memref<8x2x128xf32, #tpu.memory_space<vmem>>, vector<1x2x128xf32>
    %228 = vector.shape_cast %227 : vector<1x2x128xf32> to vector<2x128xf32>
    %229 = vector.shape_cast %226 : vector<2x128xf32> to vector<1x2x128xf32>
    tpu.vector_store %arg12[%c5_56, %c0_57, %c0_58], %229 {strides = array<i32>} : memref<8x2x128xf32, #tpu.memory_space<vmem>>, vector<1x2x128xf32>,
    %230 = arith.index_cast %arg0 : i32 to index
    %c6 = arith.constant 6 : index
    %231 = memref.load %arg4[%230, %c6] : memref<2x8xf32, #tpu.memory_space<smem>>
    %232 = arith.mulf %231, %5 : f32
    %233 = arith.index_cast %arg0 : i32 to index
    %c6_59 = arith.constant 6 : index
    %234 = memref.load %arg5[%233, %c6_59] : memref<2x8xf32, #tpu.memory_space<smem>>
    %235 = arith.mulf %234, %8 : f32
    %236 = vector.broadcast %232 : f32 to vector<2x128xf32>
    %237 = arith.subf %27, %236 : vector<2x128xf32>
    %238 = vector.broadcast %235 : f32 to vector<2x128xf32>
    %239 = arith.subf %30, %238 : vector<2x128xf32>
    %240 = arith.mulf %237, %237 : vector<2x128xf32>
    %241 = arith.mulf %239, %239 : vector<2x128xf32>
    %242 = arith.addf %240, %241 : vector<2x128xf32>
    %243 = math.sqrt %242 : vector<2x128xf32>
    %244 = arith.minimumf %212, %243 : vector<2x128xf32>
    %245 = arith.mulf %10, %243 : vector<2x128xf32>
    %246 = arith.addf %36, %245 : vector<2x128xf32>
    %247 = tpu.reciprocal %246 {approx = true} : vector<2x128xf32> -> vector<2x128xf32>
    %248 = arith.mulf %246, %247 : vector<2x128xf32>
    %cst_60 = arith.constant 2.000000e+00 : f32
    %249 = vector.broadcast %cst_60 : f32 to vector<2x128xf32>
    %250 = arith.subf %249, %248 : vector<2x128xf32>
    %251 = arith.mulf %247, %250 : vector<2x128xf32>
    %252 = arith.mulf %251, %251 : vector<2x128xf32>
    %253 = arith.mulf %252, %252 : vector<2x128xf32>
    %254 = arith.mulf %253, %253 : vector<2x128xf32>
    %255 = arith.mulf %251, %254 : vector<2x128xf32>
    %c6_61 = arith.constant 6 : index
    %c0_62 = arith.constant 0 : index
    %c0_63 = arith.constant 0 : index
    %256 = vector.load %arg12[%c6_61, %c0_62, %c0_63] : memref<8x2x128xf32, #tpu.memory_space<vmem>>, vector<1x2x128xf32>
    %257 = vector.shape_cast %256 : vector<1x2x128xf32> to vector<2x128xf32>
    %258 = arith.addf %257, %255 : vector<2x128xf32>
    %c6_64 = arith.constant 6 : index
    %c0_65 = arith.constant 0 : index
    %c0_66 = arith.constant 0 : index
    %259 = vector.load %arg12[%c6_64, %c0_65, %c0_66] : memref<8x2x128xf32, #tpu.memory_space<vmem>>, vector<1x2x128xf32>
    %260 = vector.shape_cast %259 : vector<1x2x128xf32> to vector<2x128xf32>
    %261 = vector.shape_cast %258 : vector<2x128xf32> to vector<1x2x128xf32>
    tpu.vector_store %arg12[%c6_64, %c0_65, %c0_66], %261 {strides = array<i32>} : memref<8x2x128xf32, #tpu.memory_space<vmem>>, vector<1x2x128xf32>,
    %262 = arith.index_cast %arg0 : i32 to index
    %c7 = arith.constant 7 : index
    %263 = memref.load %arg4[%262, %c7] : memref<2x8xf32, #tpu.memory_space<smem>>
    %264 = arith.mulf %263, %5 : f32
    %265 = arith.index_cast %arg0 : i32 to index
    %c7_67 = arith.constant 7 : index
    %266 = memref.load %arg5[%265, %c7_67] : memref<2x8xf32, #tpu.memory_space<smem>>
    %267 = arith.mulf %266, %8 : f32
    %268 = vector.broadcast %264 : f32 to vector<2x128xf32>
    %269 = arith.subf %27, %268 : vector<2x128xf32>
    %270 = vector.broadcast %267 : f32 to vector<2x128xf32>
    %271 = arith.subf %30, %270 : vector<2x128xf32>
    %272 = arith.mulf %269, %269 : vector<2x128xf32>
    %273 = arith.mulf %271, %271 : vector<2x128xf32>
    %274 = arith.addf %272, %273 : vector<2x128xf32>
    %275 = math.sqrt %274 : vector<2x128xf32>
    %276 = arith.minimumf %244, %275 : vector<2x128xf32>
    %277 = arith.mulf %10, %275 : vector<2x128xf32>
    %278 = arith.addf %36, %277 : vector<2x128xf32>
    %279 = tpu.reciprocal %278 {approx = true} : vector<2x128xf32> -> vector<2x128xf32>
    %280 = arith.mulf %278, %279 : vector<2x128xf32>
    %cst_68 = arith.constant 2.000000e+00 : f32
    %281 = vector.broadcast %cst_68 : f32 to vector<2x128xf32>
    %282 = arith.subf %281, %280 : vector<2x128xf32>
    %283 = arith.mulf %279, %282 : vector<2x128xf32>
    %284 = arith.mulf %283, %283 : vector<2x128xf32>
    %285 = arith.mulf %284, %284 : vector<2x128xf32>
    %286 = arith.mulf %285, %285 : vector<2x128xf32>
    %287 = arith.mulf %283, %286 : vector<2x128xf32>
    %c7_69 = arith.constant 7 : index
    %c0_70 = arith.constant 0 : index
    %c0_71 = arith.constant 0 : index
    %288 = vector.load %arg12[%c7_69, %c0_70, %c0_71] : memref<8x2x128xf32, #tpu.memory_space<vmem>>, vector<1x2x128xf32>
    %289 = vector.shape_cast %288 : vector<1x2x128xf32> to vector<2x128xf32>
    %290 = arith.addf %289, %287 : vector<2x128xf32>
    %c7_72 = arith.constant 7 : index
    %c0_73 = arith.constant 0 : index
    %c0_74 = arith.constant 0 : index
    %291 = vector.load %arg12[%c7_72, %c0_73, %c0_74] : memref<8x2x128xf32, #tpu.memory_space<vmem>>, vector<1x2x128xf32>
    %292 = vector.shape_cast %291 : vector<1x2x128xf32> to vector<2x128xf32>
    %293 = vector.shape_cast %290 : vector<2x128xf32> to vector<1x2x128xf32>
    tpu.vector_store %arg12[%c7_72, %c0_73, %c0_74], %293 {strides = array<i32>} : memref<8x2x128xf32, #tpu.memory_space<vmem>>, vector<1x2x128xf32>,
    %c0_75 = arith.constant 0 : index
    %c0_76 = arith.constant 0 : index
    %294 = vector.load %arg11[%c0_75, %c0_76] : memref<2x128xf32, #tpu.memory_space<vmem>>, vector<2x128xf32>
    %295 = arith.addf %294, %10 : vector<2x128xf32>
    %c0_77 = arith.constant 0 : index
    %c0_78 = arith.constant 0 : index
    %296 = vector.load %arg11[%c0_77, %c0_78] : memref<2x128xf32, #tpu.memory_space<vmem>>, vector<2x128xf32>
    tpu.vector_store %arg11[%c0_77, %c0_78], %295 {strides = array<i32>} : memref<2x128xf32, #tpu.memory_space<vmem>>, vector<2x128xf32>,
    %c0_79 = arith.constant 0 : index
    %c0_80 = arith.constant 0 : index
    %297 = vector.load %arg10[%c0_79, %c0_80] : memref<2x128xf32, #tpu.memory_space<vmem>>, vector<2x128xf32>
    %298 = arith.mulf %10, %276 : vector<2x128xf32>
    %299 = arith.addf %297, %298 : vector<2x128xf32>
    %c0_81 = arith.constant 0 : index
    %c0_82 = arith.constant 0 : index
    %300 = vector.load %arg10[%c0_81, %c0_82] : memref<2x128xf32, #tpu.memory_space<vmem>>, vector<2x128xf32>
    tpu.vector_store %arg10[%c0_81, %c0_82], %299 {strides = array<i32>} : memref<2x128xf32, #tpu.memory_space<vmem>>, vector<2x128xf32>,
    %c0_i32_83 = arith.constant 0 : i32
    %301 = arith.cmpi eq, %arg2, %c0_i32_83 : i32
    %302 = arith.extui %301 : i1 to i32
    %c0_i32_84 = arith.constant 0 : i32
    %303 = arith.cmpi ne, %302, %c0_i32_84 : i32
    scf.if %303 {
      %c0_85 = arith.constant 0 : index
      %c0_86 = arith.constant 0 : index
      %304 = vector.load %arg10[%c0_85, %c0_86] : memref<2x128xf32, #tpu.memory_space<vmem>>, vector<2x128xf32>
      %305 = vector.shape_cast %304 : vector<2x128xf32> to vector<1x2x128xf32>
      %cst_87 = arith.constant dense<0.000000e+00> : vector<1xf32>
      %306 = vector.multi_reduction <add>, %305, %cst_87 [1, 2] : vector<1x2x128xf32> to vector<1xf32>
      %307 = vector.shape_cast %306 : vector<1xf32> to vector<1x1x1xf32>
      %308 = vector.extract %307[0, 0, 0] : f32 from vector<1x1x1xf32>
      %309 = vector.broadcast %308 : f32 to vector<1x1xf32>
      %310 = vector.shape_cast %309 : vector<1x1xf32> to vector<1x1x1x1xf32>
      %c0_88 = arith.constant 0 : index
      %c0_89 = arith.constant 0 : index
      %c0_90 = arith.constant 0 : index
      %c0_91 = arith.constant 0 : index
      %311 = vector.load %arg7[%c0_88, %c0_89, %c0_90, %c0_91] : memref<1x1x1x1xf32, #tpu.memory_space<vmem>>, vector<1x1x1x1xf32>
      tpu.vector_store %arg7[%c0_88, %c0_89, %c0_90, %c0_91], %310 {strides = array<i32>} : memref<1x1x1x1xf32, #tpu.memory_space<vmem>>, vector<1x1x1x1xf32>,
      %c0_92 = arith.constant 0 : index
      %c0_93 = arith.constant 0 : index
      %312 = vector.load %arg11[%c0_92, %c0_93] : memref<2x128xf32, #tpu.memory_space<vmem>>, vector<2x128xf32>
      %313 = vector.shape_cast %312 : vector<2x128xf32> to vector<1x2x128xf32>
      %cst_94 = arith.constant dense<0.000000e+00> : vector<1xf32>
      %314 = vector.multi_reduction <add>, %313, %cst_94 [1, 2] : vector<1x2x128xf32> to vector<1xf32>
      %315 = vector.shape_cast %314 : vector<1xf32> to vector<1x1x1xf32>
      %316 = vector.extract %315[0, 0, 0] : f32 from vector<1x1x1xf32>
      %317 = vector.broadcast %316 : f32 to vector<1x1xf32>
      %318 = vector.shape_cast %317 : vector<1x1xf32> to vector<1x1x1x1xf32>
      %c0_95 = arith.constant 0 : index
      %c0_96 = arith.constant 0 : index
      %c0_97 = arith.constant 0 : index
      %c0_98 = arith.constant 0 : index
      %319 = vector.load %arg8[%c0_95, %c0_96, %c0_97, %c0_98] : memref<1x1x1x1xf32, #tpu.memory_space<vmem>>, vector<1x1x1x1xf32>
      tpu.vector_store %arg8[%c0_95, %c0_96, %c0_97, %c0_98], %318 {strides = array<i32>} : memref<1x1x1x1xf32, #tpu.memory_space<vmem>>, vector<1x1x1x1xf32>,
      %c0_99 = arith.constant 0 : index
      %c0_100 = arith.constant 0 : index
      %c0_101 = arith.constant 0 : index
      %320 = vector.load %arg12[%c0_99, %c0_100, %c0_101] : memref<8x2x128xf32, #tpu.memory_space<vmem>>, vector<8x2x128xf32>
      %cst_102 = arith.constant dense<0.000000e+00> : vector<8x2xf32>
      %321 = vector.multi_reduction <add>, %320, %cst_102 [2] : vector<8x2x128xf32> to vector<8x2xf32>
      %322 = vector.shape_cast %321 : vector<8x2xf32> to vector<8x2x1xf32>
      %cst_103 = arith.constant dense<0.000000e+00> : vector<8x1xf32>
      %323 = vector.multi_reduction <add>, %322, %cst_103 [1] : vector<8x2x1xf32> to vector<8x1xf32>
      %324 = vector.shape_cast %323 : vector<8x1xf32> to vector<8x1x1xf32>
      %325 = vector.shape_cast %324 : vector<8x1x1xf32> to vector<1x1x8x1xf32>
      %c0_104 = arith.constant 0 : index
      %c0_105 = arith.constant 0 : index
      %c0_106 = arith.constant 0 : index
      %c0_107 = arith.constant 0 : index
      %326 = vector.load %arg9[%c0_104, %c0_105, %c0_106, %c0_107] : memref<1x1x8x1xf32, #tpu.memory_space<vmem>>, vector<1x1x8x1xf32>
      tpu.vector_store %arg9[%c0_104, %c0_105, %c0_106, %c0_107], %325 {strides = array<i32>} : memref<1x1x8x1xf32, #tpu.memory_space<vmem>>, vector<1x1x8x1xf32>,
    } else {
    }
    return
  }
  func.func @transform_0(%arg0: i32, %arg1: i32, %arg2: i32) -> (i32, i32) {
    %c0_i32 = arith.constant 0 : i32
    %c0_i32_0 = arith.constant 0 : i32
    %c0_i32_1 = arith.constant 0 : i32
    return %c0_i32, %c0_i32_0 : i32, i32
  }
  func.func @transform_1(%arg0: i32, %arg1: i32, %arg2: i32) -> (i32, i32) {
    %c0_i32 = arith.constant 0 : i32
    %c0_i32_0 = arith.constant 0 : i32
    %c0_i32_1 = arith.constant 0 : i32
    return %c0_i32, %c0_i32_0 : i32, i32
  }
  func.func @transform_2(%arg0: i32, %arg1: i32, %arg2: i32) -> (i32, i32) {
    %c0_i32 = arith.constant 0 : i32
    %c0_i32_0 = arith.constant 0 : i32
    %c0_i32_1 = arith.constant 0 : i32
    return %c0_i32, %c0_i32_0 : i32, i32
  }
  func.func @transform_3(%arg0: i32, %arg1: i32, %arg2: i32) -> (i32, i32, i32) {
    %c1_i32 = arith.constant 1 : i32
    %0 = arith.muli %arg1, %c1_i32 : i32
    %1 = arith.addi %0, %arg2 : i32
    %c0_i32 = arith.constant 0 : i32
    %c0_i32_0 = arith.constant 0 : i32
    return %arg0, %1, %c0_i32 : i32, i32, i32
  }
  func.func @transform_4(%arg0: i32, %arg1: i32, %arg2: i32) -> (i32, i32, i32, i32) {
    %c0_i32 = arith.constant 0 : i32
    %c0_i32_0 = arith.constant 0 : i32
    %c0_i32_1 = arith.constant 0 : i32
    return %arg0, %arg1, %c0_i32, %c0_i32_0 : i32, i32, i32, i32
  }
  func.func @transform_5(%arg0: i32, %arg1: i32, %arg2: i32) -> (i32, i32, i32, i32) {
    %c0_i32 = arith.constant 0 : i32
    %c0_i32_0 = arith.constant 0 : i32
    %c0_i32_1 = arith.constant 0 : i32
    return %arg0, %arg1, %c0_i32, %c0_i32_0 : i32, i32, i32, i32
  }
  func.func @transform_6(%arg0: i32, %arg1: i32, %arg2: i32) -> (i32, i32, i32, i32) {
    %c0_i32 = arith.constant 0 : i32
    %c0_i32_0 = arith.constant 0 : i32
    %c0_i32_1 = arith.constant 0 : i32
    return %arg0, %arg1, %c0_i32, %c0_i32_0 : i32, i32, i32, i32
  }
}

</mosaic_0001>

<bundles_post_ra>
// kernel: tpu_custom_call.1
= control target key start
LH: loop header
LB: loop body
LE: loop exit
PB: predicated region body
PF: predicated region fallthrough
CT: control target
= control target key end

     0   :  { %12 = vsyncpa [#allocation6], 0  ;;  %s1489_s0 = inlined_call_operand.hbm [shape: f32[2,2], index: 0, kind: input, shape index: {}]   ;;  %s1490_s1 = inlined_call_operand.hbm [shape: f32[2,8], index: 1, kind: input, shape index: {}]   ;;  %s1491_s2 = inlined_call_operand.hbm [shape: f32[2,8], index: 2, kind: input, shape index: {}]   ;;  %s1492_s3 = inlined_call_operand.vmem [shape: f32[2,2,128], index: 3, kind: input, shape index: {}]   ;;  %s1493_s4 = inlined_call_operand.vmem [shape: f32[2,1,1,1], index: 4, kind: output, shape index: {0}]   ;;  %s1494_s5 = inlined_call_operand.vmem [shape: f32[2,1,1,1], index: 5, kind: output, shape index: {1}]   ;;  %s1495_s6 = inlined_call_operand.vmem [shape: f32[2,1,8,1], index: 6, kind: output, shape index: {2}]  }
   0x1   :  { %13 = vsyncpa [#allocation8], 0  ;;  %s1210_s21 = smov 0   ;;  %s1212_s22 = smov 0  }
   0x2   :  { %s1214_s23 = smov 0  }
   0x3 LB: > { %s998_s24 = sadd.s32 4294967295, %s1169_s23   ;;  %p1000_p0 = scmp.ge.s32.totalorder %s1169_s23, 1  ;;  %s1169_s23 = sphi %s1214_s23, %s19_s23   ;;  %s1165_s22 = sphi %s1212_s22, %s1498_s22   ;;  %s1161_s21 = sphi %s1210_s21, %s1497_s21  }
   0x4   : > { %p220_p1 = scmp.lt.s32.totalorder %s1169_s23, 3  ;;  %p1228_p2 = scmp.eq.s32.totalorder %s998_s24, 0 }
   0x5   : > { %s38_s26 = sadd.s32 1, %s1165_s22  ;;  %s1171_s27 = smov [#allocation7]  }
   0x6   : > { %p221_p3 = pnand %p1000_p0, %p220_p1  ;;  %p40_p5 = scmp.ge.s32.totalorder %s38_s26, 2 }
   0x7   : > { %s1172_s30 = smov [#allocation5]   ;;  %s1173_s9 = smov [#allocation9]  }
   0x8   : > { %p1030_p4 = pneg %p221_p3  ;;  %s1500_s26 = smov (%p40_p5, %s38_s26), 0 }
   0xa   : > { %p1031_p6 = pnand %p1228_p2, %p1030_p4  ;;  %274 = sbr.rel (%p221_p3) target bundleno = 297 (0x129), region = 36 }
   0xc   : > { %1036 = dma.hbm_to_smem (!%p1031_p6), %s1490_s1, 32, %s1171_s27, [#allocation8]  }
   0xd   : > { %1033 = dma.hbm_to_smem (!%p1031_p6), %s1489_s0, 32, %s1172_s30, [#allocation6]  }
   0xe   : > { %1039 = dma.hbm_to_smem (!%p1031_p6), %s1491_s2, 32, %s1173_s9, [#allocation8]  }
   0xf   : > { %1152 = dma.done.wait (%p1228_p2), [#allocation6], 32  }
  0x10   : > { %1154 = vsyncadd (%p1228_p2), [#allocation6], 4294967264 }
  0x11   : > { %1156 = dma.done.wait (%p1228_p2), [#allocation8], 64  }
  0x12   : > { %1158 = vsyncadd (%p1228_p2), [#allocation8], 4294967232 }
  0x13   : > { %288 = sfence }
  0x14   : > { %p331_p7 = scmp.lt.s32.totalorder %s1161_s21, 1  ;;  %s1256_s12 = sshll.u32 %s1161_s21, 7  ;;  %v379_v0 = vlaneseq  ;;  %v1174_v1 = vmov 0.0  }
  0x15   : > { %362 = vst [vmem:[#allocation2] sm:$0x3] %v1174_v1  ;;  %s373_s13 = sld [smem:[#allocation5 + %s1256_s12]]  ;;  %s375_s14 = sadd.s32 1, %s1256_s12  ;;  %363 = vst [vmem:[#allocation3] sm:$0x3] %v1174_v1 }
  0x16   : > { %364 = vst [vmem:[#allocation4] sm:$0x3] %v1174_v1  ;;  %365 = vst [vmem:[#allocation4 + $0x2] sm:$0x3] %v1174_v1  ;;  %s1502_s21 = smov (!%p331_p7, %s1161_s21), 1  ;;  %v380_v2 = vshrl.u32 %v379_v0, 7 }
  0x17   : > { %366 = vst [vmem:[#allocation4 + $0x4] sm:$0x3] %v1174_v1  ;;  %367 = vst [vmem:[#allocation4 + $0x6] sm:$0x3] %v1174_v1  ;;  %v382_v3 = vand.u32 127, %v379_v0  ;;  %s376_s15 = sld [smem:[#allocation5 + %s375_s14]] }
  0x18   : > { %368 = vst [vmem:[#allocation4 + $0x8] sm:$0x3] %v1174_v1  ;;  %369 = vst [vmem:[#allocation4 + $0xa] sm:$0x3] %v1174_v1  ;;  %s464_s16 = sadd.s32 2, %s1256_s12  ;;  %s1009_s17 = sshll.u32 %s1502_s21, 1 }
  0x19   : > { %370 = vst [vmem:[#allocation4 + $0xc] sm:$0x3] %v1174_v1  ;;  %371 = vst [vmem:[#allocation4 + $0xe] sm:$0x3] %v1174_v1  ;;  %v385_v4 = vand.u32 15, %v382_v3  ;;  %v388_v5 = vmul.u32 8, %v380_v2  ;;  %s337_s24 = scalar_lea.vmem %s1492_s3, %s1009_s17 }
  0x1a   : > { %v389_v6 = vshra.s32 %v382_v3, 4  ;;  %s400_s18 = sld [smem:[#allocation7 + %s1256_s12]]  ;;  %s498_s28 = sadd.s32 3, %s1256_s12  ;;  %v1279_v8 = vld [vmem:[%s337_s24] sm:$0x3] }
  0x1b   : > { %s402_s25 = sld [smem:[#allocation9 + %s1256_s12]]  ;;  %s1275_s29 = smul.f32 0.0625, %s373_s13  ;;  %v394_v10 = vcvt.s32.f32 %v385_v4  ;;  %v397_v57 = vsub.f32 1.0, %v1279_v8 }
  0x1c   : > { %v390_v7 = vadd.s32 %v389_v6, %v388_v5  ;;  %s1272_s27 = sld [smem:[#allocation7 + %s375_s14]]  ;;  %s532_s8 = sadd.s32 4, %s1256_s12  ;;  %v668_v11 = vld [vmem:[#allocation3] sm:$0x3] }
  0x1d   : > { %s1277_s30 = sld [smem:[#allocation9 + %s375_s14]]  ;;  %s1284_s9 = smul.f32 0.0625, %s376_s15  ;;  %v392_v12 = vstv %s1275_s29  ;;  %v669_v13 = vadd.f32 %v668_v11, %v1279_v8 }
  0x1e   : > { %v391_v9 = vcvt.s32.f32 %v390_v7  ;;  %s1281_s7 = sld [smem:[#allocation7 + %s464_s16]]  ;;  %s566_s24 = sadd.s32 5, %s1256_s12 }
  0x1f   : > { %s1287_s10 = sld [smem:[#allocation9 + %s464_s16]]  ;;  %v395_v15 = vstv %s1284_s9  ;;  %670 = vst [vmem:[#allocation3] sm:$0x3] %v669_v13 }
  0x20   : > { %v1290_v14 = vmul.f32 %v392_v12, %v391_v9  ;;  %s401_s11 = smul.f32 %s400_s18, %s1275_s29  ;;  %s1293_s13 = sld [smem:[#allocation7 + %s498_s28]]  ;;  %v1299_v16 = vmul.f32 %v395_v15, %v394_v10  ;;  %v398_v10 = vmul.f32 22.627417, %v397_v57 }
  0x21   : > { %s403_s14 = smul.f32 %s402_s25, %s1284_s9  ;;  %s1297_s15 = sld [smem:[#allocation9 + %s498_s28]] }
  0x22   : > { %v404_v17 = vstv %s401_s11  ;;  %s432_s16 = smul.f32 %s1272_s27, %s1275_s29  ;;  %s1303_s17 = sld [smem:[#allocation7 + %s532_s8]] }
  0x23   : > { %v405_v18 = vsub.f32 %v1290_v14, %v404_v17  ;;  %v406_v19 = vstv %s403_s14  ;;  %s434_s18 = smul.f32 %s1277_s30, %s1284_s9  ;;  %s1308_s19 = sld [smem:[#allocation9 + %s532_s8]] }
  0x24   : > { %v407_v20 = vsub.f32 %v1299_v16, %v406_v19  ;;  %v435_v21 = vstv %s432_s16  ;;  %s466_s20 = smul.f32 %s1281_s7, %s1275_s29  ;;  %s1317_s27 = sld [smem:[#allocation7 + %s566_s24]]  ;;  %v1398_v19 = vadd.f32 1e-06, %v398_v10 }
  0x25   : > { %v408_v22 = vmul.f32 %v405_v18, %v405_v18  ;;  %v436_v23 = vsub.f32 %v1290_v14, %v435_v21  ;;  %v437_v24 = vstv %s434_s18  ;;  %s468_s25 = smul.f32 %s1287_s10, %s1284_s9  ;;  %s1322_s30 = sld [smem:[#allocation9 + %s566_s24]] }
  0x26   : > { %v409_v25 = vmul.f32 %v407_v20, %v407_v20  ;;  %v438_v26 = vsub.f32 %v1299_v16, %v437_v24  ;;  %v469_v27 = vstv %s466_s20  ;;  %s500_s28 = smul.f32 %s1293_s13, %s1275_s29  ;;  %s600_s8 = sadd.s32 6, %s1256_s12 }
  0x27   : > { %v439_v28 = vmul.f32 %v436_v23, %v436_v23  ;;  %v470_v29 = vsub.f32 %v1290_v14, %v469_v27  ;;  %v471_v30 = vstv %s468_s25  ;;  %s502_s7 = smul.f32 %s1297_s15, %s1284_s9  ;;  %s1333_s11 = sld [smem:[#allocation7 + %s600_s8]] }
  0x28   : > { %v1328_v31 = vadd.f32 %v409_v25, %v408_v22  ;;  %v440_v32 = vmul.f32 %v438_v26, %v438_v26  ;;  %v472_v33 = vsub.f32 %v1299_v16, %v471_v30  ;;  %v503_v34 = vstv %s500_s28  ;;  %s534_s10 = smul.f32 %s1303_s17, %s1275_s29  ;;  %s1338_s14 = sld [smem:[#allocation9 + %s600_s8]] }
  0x29   : > { %v504_v35 = vsub.f32 %v1290_v14, %v503_v34  ;;  %v505_v36 = vstv %s502_s7  ;;  %s536_s13 = smul.f32 %s1308_s19, %s1284_s9  ;;  %v473_v37 = vmul.f32 %v470_v29, %v470_v29  ;;  %s634_s15 = sadd.s32 7, %s1256_s12 }
  0x2a   : > { %1074 = vrsqrt.f32 %v1328_v31  ;;  %v1342_v38 = vadd.f32 %v440_v32, %v439_v28  ;;  %v474_v39 = vmul.f32 %v472_v33, %v472_v33  ;;  %v506_v40 = vsub.f32 %v1299_v16, %v505_v36  ;;  %s568_s16 = smul.f32 %s1317_s27, %s1275_s29  ;;  %s1347_s17 = sld [smem:[#allocation7 + %s634_s15]] }
  0x2b   : > { %v537_v41 = vstv %s534_s10  ;;  %v539_v42 = vstv %s536_s13  ;;  %s570_s18 = smul.f32 %s1322_s30, %s1284_s9  ;;  %s1351_s19 = sld [smem:[#allocation9 + %s634_s15]]  ;;  %v507_v43 = vmul.f32 %v504_v35, %v504_v35  ;;  %vm413_vm0 = vcmp.eq.f32.partialorder %v1328_v31, inf }
  0x2c   : > { %1076 = vrsqrt.f32 %v1342_v38  ;;  %v1354_v44 = vadd.f32 %v474_v39, %v473_v37  ;;  %v508_v45 = vmul.f32 %v506_v40, %v506_v40  ;;  %v538_v46 = vsub.f32 %v1290_v14, %v537_v41  ;;  %s344_s8 = scalar_lea.vmem %s1493_s4, %s1502_s21 }
  0x2d   : > { %v540_v47 = vsub.f32 %v1299_v16, %v539_v42  ;;  %s602_s12 = smul.f32 %s1333_s11, %s1275_s29  ;;  %v571_v48 = vstv %s568_s16  ;;  %v573_v49 = vstv %s570_s18  ;;  %v416_v7 = vand.u32 2147483648, %v1328_v31 }
  0x2e   : > { %s604_s20 = smul.f32 %s1338_s14, %s1284_s9  ;;  %1078 = vrsqrt.f32 %v1354_v44  ;;  %v1363_v50 = vadd.f32 %v508_v45, %v507_v43  ;;  %v541_v51 = vmul.f32 %v538_v46, %v538_v46  ;;  %v572_v53 = vsub.f32 %v1290_v14, %v571_v48  ;;  %s350_s14 = scalar_lea.vmem %s1494_s5, %s1502_s21 }
  0x2f   : > { %v542_v52 = vmul.f32 %v540_v47, %v540_v47  ;;  %v574_v54 = vsub.f32 %v1299_v16, %v573_v49  ;;  %v605_v55 = vstv %s602_s12  ;;  %vm415_vm1 = vcmp.eq.f32.partialorder %v1328_v31, 0.0 }
  0x30   : > { %s636_s24 = smul.f32 %s1347_s17, %s1275_s29  ;;  %v607_v56 = vstv %s604_s20  ;;  %1080 = vrsqrt.f32 %v1363_v50  ;;  %v575_v59 = vmul.f32 %v572_v53, %v572_v53  ;;  %v606_v61 = vsub.f32 %v1290_v14, %v605_v55  ;;  %s1010_s29 = sshll.u32 %s1502_s21, 3 }
  0x31   : > { %s638_s25 = smul.f32 %s1351_s19, %s1284_s9  ;;  %v1373_v58 = vadd.f32 %v542_v52, %v541_v51  ;;  %v576_v60 = vmul.f32 %v574_v54, %v574_v54  ;;  %v608_v62 = vsub.f32 %v1299_v16, %v607_v56  ;;  %vm444_vm2 = vcmp.eq.f32.partialorder %v1342_v38, inf  ;;  %s357_s28 = scalar_lea.vmem %s1495_s6, %s1010_s29 }
  0x32   : > { %v639_v63 = vstv %s636_s24  ;;  %v609_v3 = vmul.f32 %v606_v61, %v606_v61  ;;  %v447_v11 = vand.u32 2147483648, %v1342_v38  ;;  %vm446_vm3 = vcmp.eq.f32.partialorder %v1342_v38, 0.0 }
  0x33   : > { %v641_v0 = vstv %s638_s25  ;;  %1082 = vrsqrt.f32 %v1373_v58  ;;  %v1379_v2 = vadd.f32 %v576_v60, %v575_v59  ;;  %v610_v4 = vmul.f32 %v608_v62, %v608_v62 }
  0x34   : > { %v640_v5 = vsub.f32 %v1290_v14, %v639_v63  ;;  %v642_v9 = vsub.f32 %v1299_v16, %v641_v0  ;;  %vm478_vm4 = vcmp.eq.f32.partialorder %v1354_v44, inf  ;;  %v481_v22 = vand.u32 2147483648, %v1354_v44 }
  0x35   : > { %1084 = vrsqrt.f32 %v1379_v2  ;;  %v1392_v14 = vadd.f32 %v610_v4, %v609_v3  ;;  %vm480_vm5 = vcmp.eq.f32.partialorder %v1354_v44, 0.0  ;;  %vm512_vm6 = vcmp.eq.f32.partialorder %v1363_v50, inf }
  0x36   : > { %v643_v15 = vmul.f32 %v640_v5, %v640_v5  ;;  %v644_v17 = vmul.f32 %v642_v9, %v642_v9  ;;  %v515_v30 = vand.u32 2147483648, %v1363_v50  ;;  %vm514_vm7 = vcmp.eq.f32.partialorder %v1363_v50, 0.0 }
  0x37   : > { %v1075_v1 = vpop.eup %1074  ;;  %1086 = vrsqrt.f32 %v1392_v14  ;;  %vm546_vm8 = vcmp.eq.f32.partialorder %v1373_v58, inf  ;;  %vm548_vm9 = vcmp.eq.f32.partialorder %v1373_v58, 0.0  ;;  %v549_v40 = vand.u32 2147483648, %v1373_v58 }
  0x38   : > { %v412_v6 = vmul.f32 %v1075_v1, %v1328_v31  ;;  %v1402_v23 = vadd.f32 %v644_v17, %v643_v15  ;;  %vm580_vm10 = vcmp.eq.f32.partialorder %v1379_v2, inf  ;;  %v583_v48 = vand.u32 2147483648, %v1379_v2  ;;  %v671_v15 = vld [vmem:[#allocation2] sm:$0x3] }
  0x39   : > { %v1077_v12 = vpop.eup %1076  ;;  %vm582_vm11 = vcmp.eq.f32.partialorder %v1379_v2, 0.0  ;;  %vm614_vm12 = vcmp.eq.f32.partialorder %v1392_v14, inf  ;;  %v617_v56 = vand.u32 2147483648, %v1392_v14  ;;  %vm616_vm13 = vcmp.eq.f32.partialorder %v1392_v14, 0.0 }
  0x3a   : > { %v414_v13 = vsel %vm413_vm0, %v1328_v31, %v412_v6  ;;  %v443_v16 = vmul.f32 %v1077_v12, %v1342_v38  ;;  %1088 = vrsqrt.f32 %v1402_v23  ;;  %vm648_vm14 = vcmp.eq.f32.partialorder %v1402_v23, inf }
  0x3b   : > { %v417_v18 = vsel %vm415_vm1, %v416_v7, %v414_v13  ;;  %v1079_v20 = vpop.eup %1078  ;;  %v651_v0 = vand.u32 2147483648, %v1402_v23  ;;  %vm650_vm15 = vcmp.eq.f32.partialorder %v1402_v23, 0.0  ;;  %vm679_vm0 = vcmask 1041408  }
  0x3c   : > { %v445_v21 = vsel %vm444_vm2, %v1342_v38, %v443_v16  ;;  %v418_v24 = vmul.f32 %v417_v18, %v1279_v8  ;;  %v477_v26 = vmul.f32 %v1079_v20, %v1354_v44  ;;  %vm802_vm1 = vcmask 1041409  }
  0x3d   : > { %v448_v25 = vsel %vm446_vm3, %v447_v11, %v445_v21  ;;  %v1081_v28 = vpop.eup %1080  ;;  %vm804_vm2 = vcmask 1042434   ;;  %vm806_vm3 = vcmask 1043459  }
  0x3e   : > { %v449_v27 = vmin.f32 %v417_v18, %v448_v25  ;;  %v479_v29 = vsel %vm478_vm4, %v1354_v44, %v477_v26  ;;  %v419_v31 = vadd.f32 %v418_v24, %v1398_v19  ;;  %v450_v32 = vmul.f32 %v448_v25, %v1279_v8 }
  0x3f   : > { %v482_v33 = vsel %vm480_vm5, %v481_v22, %v479_v29  ;;  %v511_v34 = vmul.f32 %v1081_v28, %v1363_v50  ;;  %vm808_vm4 = vcmask 1044484   ;;  %vm810_vm5 = vcmask 1045509  }
  0x40   : > { %v483_v35 = vmin.f32 %v449_v27, %v482_v33  ;;  %1090 = vrcp.f32 %v419_v31  ;;  %v451_v36 = vadd.f32 %v450_v32, %v1398_v19  ;;  %v484_v37 = vmul.f32 %v482_v33, %v1279_v8  ;;  %v1083_v38 = vpop.eup %1082 }
  0x41   : > { %v513_v39 = vsel %vm512_vm6, %v1363_v50, %v511_v34  ;;  %v545_v42 = vmul.f32 %v1083_v38, %v1373_v58  ;;  %v428_v38 = vld [vmem:[#allocation4] sm:$0x3]  ;;  %vm812_vm6 = vcmask 1046534  }
  0x42   : > { %v516_v41 = vsel %vm514_vm7, %v515_v30, %v513_v39  ;;  %1092 = vrcp.f32 %v451_v36  ;;  %v485_v43 = vadd.f32 %v484_v37, %v1398_v19  ;;  %v1085_v46 = vpop.eup %1084  ;;  %vm814_vm7 = vcmask 1047559  }
  0x43   : > { %v517_v44 = vmin.f32 %v483_v35, %v516_v41  ;;  %v518_v45 = vmul.f32 %v516_v41, %v1279_v8  ;;  %v547_v47 = vsel %vm546_vm8, %v1373_v58, %v545_v42  ;;  %v579_v50 = vmul.f32 %v1085_v46, %v1379_v2 }
  0x44   : > { %1094 = vrcp.f32 %v485_v43  ;;  %v550_v49 = vsel %vm548_vm9, %v549_v40, %v547_v47  ;;  %v1087_v54 = vpop.eup %1086  ;;  %vm817_vm8 = vcmask 7168   ;;  %vm691_vm9 = vcmask 0  }
  0x45   : > { %v519_v51 = vadd.f32 %v518_v45, %v1398_v19  ;;  %v551_v52 = vmin.f32 %v517_v44, %v550_v49  ;;  %v552_v53 = vmul.f32 %v550_v49, %v1279_v8  ;;  %v581_v55 = vsel %vm580_vm10, %v1379_v2, %v579_v50  ;;  %v461_v45 = vld [vmem:[#allocation4 + $0x2] sm:$0x3]  ;;  %v693_v49 = vld [vmem:[#allocation3] sm:$0x3] }
  0x46   : > { %v584_v57 = vsel %vm582_vm11, %v583_v48, %v581_v55  ;;  %v613_v58 = vmul.f32 %v1087_v54, %v1392_v14 }
  0x47   : > { %1096 = vrcp.f32 %v519_v51  ;;  %v553_v59 = vadd.f32 %v552_v53, %v1398_v19  ;;  %v585_v60 = vmin.f32 %v551_v52, %v584_v57  ;;  %v586_v61 = vmul.f32 %v584_v57, %v1279_v8  ;;  %v1089_v62 = vpop.eup %1088 }
  0x48   : > { %v615_v63 = vsel %vm614_vm12, %v1392_v14, %v613_v58  ;;  %v647_v2 = vmul.f32 %v1089_v62, %v1402_v23 }
  0x49   : > { %1098 = vrcp.f32 %v553_v59  ;;  %v618_v1 = vsel %vm616_vm13, %v617_v56, %v615_v63  ;;  %v587_v3 = vadd.f32 %v586_v61, %v1398_v19  ;;  %v495_v56 = vld [vmem:[#allocation4 + $0x4] sm:$0x3]  ;;  %v694_v63 = vsel %vm679_vm0, %v693_v49, 0.0 }
  0x4a   : > { %v619_v4 = vmin.f32 %v585_v60, %v618_v1  ;;  %v620_v5 = vmul.f32 %v618_v1, %v1279_v8  ;;  %v649_v7 = vsel %vm648_vm14, %v1402_v23, %v647_v2 }
  0x4b   : > { %1100 = vrcp.f32 %v587_v3  ;;  %v652_v9 = vsel %vm650_vm15, %v651_v0, %v649_v7 }
  0x4c   : > { %v621_v11 = vadd.f32 %v620_v5, %v1398_v19  ;;  %v653_v13 = vmin.f32 %v619_v4, %v652_v9  ;;  %v654_v14 = vmul.f32 %v652_v9, %v1279_v8  ;;  %v529_v4 = vld [vmem:[#allocation4 + $0x6] sm:$0x3] }
  0x4d   : > { %v1091_v6 = vpop.eup %1090 }
  0x4e   : > { %v421_v10 = vmul.f32 %v1091_v6, %v419_v31  ;;  %1102 = vrcp.f32 %v621_v11  ;;  %v672_v20 = vmul.f32 %v653_v13, %v1279_v8  ;;  %v655_v21 = vadd.f32 %v654_v14, %v1398_v19 }
  0x4f   : > { %v1093_v12 = vpop.eup %1092 }
  0x50   : > { %v422_v17 = vsub.f32 2.0, %v421_v10  ;;  %v453_v16 = vmul.f32 %v1093_v12, %v451_v36  ;;  %v673_v25 = vadd.f32 %v672_v20, %v671_v15  ;;  %1104 = vrcp.f32 %v655_v21  ;;  %v563_v15 = vld [vmem:[#allocation4 + $0x8] sm:$0x3] }
  0x51   : > { %v1095_v18 = vpop.eup %1094 }
  0x52   : > { %v423_v22 = vmul.f32 %v1091_v6, %v422_v17  ;;  %v454_v23 = vsub.f32 2.0, %v453_v16  ;;  %v487_v24 = vmul.f32 %v1095_v18, %v485_v43  ;;  %674 = vst [vmem:[#allocation2] sm:$0x3] %v673_v25 }
  0x54   : > { %v1097_v26 = vpop.eup %1096  ;;  %v424_v27 = vmul.f32 %v423_v22, %v423_v22  ;;  %v455_v28 = vmul.f32 %v1093_v12, %v454_v23  ;;  %v488_v29 = vsub.f32 2.0, %v487_v24 }
  0x55   : > { %v521_v30 = vmul.f32 %v1097_v26, %v519_v51 }
  0x56   : > { %v425_v31 = vmul.f32 %v424_v27, %v424_v27  ;;  %v456_v32 = vmul.f32 %v455_v28, %v455_v28  ;;  %v489_v33 = vmul.f32 %v1095_v18, %v488_v29  ;;  %v1099_v34 = vpop.eup %1098 }
  0x57   : > { %v522_v35 = vsub.f32 2.0, %v521_v30  ;;  %v555_v19 = vmul.f32 %v1099_v34, %v553_v59 }
  0x58   : > { %v426_v36 = vmul.f32 %v425_v31, %v425_v31  ;;  %v457_v8 = vmul.f32 %v456_v32, %v456_v32  ;;  %v490_v37 = vmul.f32 %v489_v33, %v489_v33  ;;  %v1101_v40 = vpop.eup %1100 }
  0x59   : > { %v523_v39 = vmul.f32 %v1097_v26, %v522_v35  ;;  %v556_v44 = vsub.f32 2.0, %v555_v19  ;;  %v589_v47 = vmul.f32 %v1101_v40, %v587_v3  ;;  %v678_v48 = vld [vmem:[#allocation2] sm:$0x3]  ;;  %v597_v26 = vld [vmem:[#allocation4 + $0xa] sm:$0x3] }
  0x5a   : > { %v427_v41 = vmul.f32 %v426_v36, %v423_v22  ;;  %v458_v42 = vmul.f32 %v457_v8, %v457_v8  ;;  %v491_v43 = vmul.f32 %v490_v37, %v490_v37  ;;  %v680_v55 = vsel %vm679_vm0, %v678_v48, 0.0 }
  0x5b   : > { %v524_v46 = vmul.f32 %v523_v39, %v523_v39  ;;  %v557_v53 = vmul.f32 %v1099_v34, %v556_v44  ;;  %v1103_v54 = vpop.eup %1102  ;;  %v590_v58 = vsub.f32 2.0, %v589_v47  ;;  %681 = vadd.xlane.f32.xlu0 %v680_v55  ;;  %v631_v34 = vld [vmem:[#allocation4 + $0xc] sm:$0x3] }
  0x5c   : > { %v429_v50 = vadd.f32 %v428_v38, %v427_v41  ;;  %v459_v51 = vmul.f32 %v458_v42, %v455_v28  ;;  %v492_v52 = vmul.f32 %v491_v43, %v491_v43  ;;  %v623_v62 = vmul.f32 %v1103_v54, %v621_v11 }
  0x5d   : > { %v525_v57 = vmul.f32 %v524_v46, %v524_v46  ;;  %v558_v61 = vmul.f32 %v557_v53, %v557_v53  ;;  %v591_v1 = vmul.f32 %v1101_v40, %v590_v58  ;;  %v1105_v2 = vpop.eup %1104 }
  0x5e   : > { %430 = vst [vmem:[#allocation4] sm:$0x3] %v429_v50  ;;  %v462_v59 = vadd.f32 %v461_v45, %v459_v51  ;;  %v493_v60 = vmul.f32 %v492_v52, %v489_v33  ;;  %v624_v6 = vsub.f32 2.0, %v623_v62  ;;  %v657_v10 = vmul.f32 %v1105_v2, %v655_v21 }
  0x5f   : > { %v526_v0 = vmul.f32 %v525_v57, %v525_v57  ;;  %v559_v5 = vmul.f32 %v558_v61, %v558_v61  ;;  %v592_v9 = vmul.f32 %v591_v1, %v591_v1  ;;  %695 = vadd.xlane.f32.xlu0 %v694_v63 }
  0x60   : > { %463 = vst [vmem:[#allocation4 + $0x2] sm:$0x3] %v462_v59  ;;  %v496_v3 = vadd.f32 %v495_v56, %v493_v60  ;;  %v625_v13 = vmul.f32 %v1103_v54, %v624_v6  ;;  %v658_v17 = vsub.f32 2.0, %v657_v10 }
  0x61   : > { %v527_v7 = vmul.f32 %v526_v0, %v523_v39  ;;  %v560_v12 = vmul.f32 %v559_v5, %v559_v5  ;;  %v593_v11 = vmul.f32 %v592_v9, %v592_v9  ;;  %v665_v39 = vld [vmem:[#allocation4 + $0xe] sm:$0x3] }
  0x62   : > { %497 = vst [vmem:[#allocation4 + $0x4] sm:$0x3] %v496_v3  ;;  %v626_v18 = vmul.f32 %v625_v13, %v625_v13  ;;  %v659_v23 = vmul.f32 %v1105_v2, %v658_v17 }
  0x63   : > { %v530_v14 = vadd.f32 %v529_v4, %v527_v7  ;;  %v561_v16 = vmul.f32 %v560_v12, %v557_v53  ;;  %v594_v22 = vmul.f32 %v593_v11, %v593_v11 }
  0x64   : > { %v627_v27 = vmul.f32 %v626_v18, %v626_v18  ;;  %v660_v29 = vmul.f32 %v659_v23, %v659_v23 }
  0x65   : > { %v706_v20 = vld [vmem:[#allocation4] sm:$0x3]  ;;  %531 = vst [vmem:[#allocation4 + $0x6] sm:$0x3] %v530_v14  ;;  %v564_v25 = vadd.f32 %v563_v15, %v561_v16  ;;  %v595_v28 = vmul.f32 %v594_v22, %v591_v1 }
  0x66   : > { %v714_v24 = vsel %vm679_vm0, %v706_v20, 0.0  ;;  %v628_v31 = vmul.f32 %v627_v27, %v627_v27  ;;  %v661_v35 = vmul.f32 %v660_v29, %v660_v29 }
  0x67   : > { %715 = vadd.xlane.f32.xlu1 %v714_v24  ;;  %v707_v21 = vld [vmem:[#allocation4 + $0x2] sm:$0x3]  ;;  %565 = vst [vmem:[#allocation4 + $0x8] sm:$0x3] %v564_v25  ;;  %v598_v33 = vadd.f32 %v597_v26, %v595_v28 }
  0x68   : > { %v717_v30 = vsel %vm679_vm0, %v707_v21, 0.0  ;;  %v629_v8 = vmul.f32 %v628_v31, %v625_v13  ;;  %v662_v37 = vmul.f32 %v661_v35, %v661_v35 }
  0x69   : > { %v708_v32 = vld [vmem:[#allocation4 + $0x4] sm:$0x3]  ;;  %599 = vst [vmem:[#allocation4 + $0xa] sm:$0x3] %v598_v33 }
  0x6a   : > { %v720_v36 = vsel %vm679_vm0, %v708_v32, 0.0  ;;  %v632_v38 = vadd.f32 %v631_v34, %v629_v8  ;;  %v663_v41 = vmul.f32 %v662_v37, %v659_v23 }
  0x6b   : > { %718 = vadd.xlane.f32.xlu1 %v717_v30  ;;  %721 = vadd.xlane.f32.xlu0 %v720_v36 }
  0x6c   : > { %v709_v19 = vld [vmem:[#allocation4 + $0x6] sm:$0x3]  ;;  %633 = vst [vmem:[#allocation4 + $0xc] sm:$0x3] %v632_v38  ;;  %v666_v43 = vadd.f32 %v665_v39, %v663_v41 }
  0x6d   : > { %v723_v40 = vsel %vm679_vm0, %v709_v19, 0.0 }
  0x6e   : > { %v710_v42 = vld [vmem:[#allocation4 + $0x8] sm:$0x3]  ;;  %667 = vst [vmem:[#allocation4 + $0xe] sm:$0x3] %v666_v43 }
  0x6f   : > { %724 = vadd.xlane.f32.xlu1 %v723_v40  ;;  %v726_v44 = vsel %vm679_vm0, %v710_v42, 0.0 }
  0x70   : > { %727 = vadd.xlane.f32.xlu0 %v726_v44  ;;  %v711_v45 = vld [vmem:[#allocation4 + $0xa] sm:$0x3] }
  0x71   : > { %v729_v46 = vsel %vm679_vm0, %v711_v45, 0.0 }
  0x73   : > { %730 = vadd.xlane.f32.xlu1 %v729_v46  ;;  %v712_v47 = vld [vmem:[#allocation4 + $0xc] sm:$0x3] }
  0x74   : > { %v732_v48 = vsel %vm679_vm0, %v712_v47, 0.0 }
  0x75   : > { %733 = vadd.xlane.f32.xlu0 %v732_v48  ;;  %v713_v49 = vld [vmem:[#allocation4 + $0xe] sm:$0x3] }
  0x76   : > { %v735_v50 = vsel %vm679_vm0, %v713_v49, 0.0 }
  0x77   : > { %736 = vadd.xlane.f32.xlu1 %v735_v50 }
  0xe4   : > { %v682_v51 = vpop.xlane.xlu0 %681 }
  0xe5   : > { %v683_v52 = vrot.slane %v682_v51, 4 }
  0xe7   : > { %v684_v53 = vadd.f32 %v683_v52, %v682_v51 }
  0xe8   : > { %v696_v54 = vpop.xlane.xlu0 %695 }
  0xe9   : > { %v685_v55 = vrot.slane %v684_v53, 2  ;;  %v697_v56 = vrot.slane %v696_v54, 4 }
  0xeb   : > { %v698_v57 = vadd.f32 %v697_v56, %v696_v54  ;;  %v686_v58 = vadd.f32 %v685_v55, %v684_v53 }
  0xed   : > { %v699_v59 = vrot.slane %v698_v57, 2  ;;  %v687_v60 = vrot.slane %v686_v58, 1 }
  0xef   : > { %v688_v63 = vadd.f32 %v687_v60, %v686_v58  ;;  %v700_v0 = vadd.f32 %v699_v59, %v698_v57 }
  0xf0   : > { %v716_v61 = vpop.xlane.xlu1 %715 }
  0xf1   : > { %v738_v62 = vsel %vm679_vm0, %v716_v61, 0.0  ;;  %1014 = vpush %v688_v63  ;;  %v701_v2 = vrot.slane %v700_v0, 1 }
  0xf2   : > { %v739_v1 = vrot.slane %v738_v62, 4 }
  0xf3   : > { %v702_v9 = vadd.f32 %v701_v2, %v700_v0 }
  0xf4   : > { %v740_v3 = vadd.f32 %v739_v1, %v738_v62  ;;  %v719_v4 = vpop.xlane.xlu1 %718  ;;  %v722_v5 = vpop.xlane.xlu0 %721 }
  0xf5   : > { %v745_v6 = vsel %vm679_vm0, %v719_v4, 0.0  ;;  %v752_v7 = vsel %vm679_vm0, %v722_v5, 0.0  ;;  %1016 = vpush %v702_v9 }
  0xf6   : > { %v741_v10 = vrot.slane %v740_v3, 2  ;;  %v746_v12 = vrot.slane %v745_v6, 4  ;;  %v753_v13 = vrot.slane %v752_v7, 4 }
  0xf8   : > { %v742_v14 = vadd.f32 %v741_v10, %v740_v3  ;;  %v747_v15 = vadd.f32 %v746_v12, %v745_v6  ;;  %v754_v11 = vadd.f32 %v753_v13, %v752_v7  ;;  %v725_v17 = vpop.xlane.xlu1 %724 }
  0xf9   : > { %v759_v16 = vsel %vm679_vm0, %v725_v17, 0.0  ;;  %v728_v24 = vpop.xlane.xlu0 %727 }
  0xfa   : > { %v743_v18 = vrot.slane %v742_v14, 1  ;;  %v748_v20 = vrot.slane %v747_v15, 2  ;;  %v755_v22 = vrot.slane %v754_v11, 2  ;;  %v760_v23 = vrot.slane %v759_v16, 4 }
  0xfb   : > { %v766_v25 = vsel %vm679_vm0, %v728_v24, 0.0 }
  0xfc   : > { %v749_v26 = vadd.f32 %v748_v20, %v747_v15  ;;  %v756_v27 = vadd.f32 %v755_v22, %v754_v11  ;;  %v761_v21 = vadd.f32 %v760_v23, %v759_v16  ;;  %v744_v28 = vadd.f32 %v743_v18, %v742_v14  ;;  %v731_v30 = vpop.xlane.xlu1 %730 }
  0xfd   : > { %v767_v29 = vrot.slane %v766_v25, 4  ;;  %v773_v34 = vsel %vm679_vm0, %v731_v30, 0.0 }
  0xfe   : > { %v750_v31 = vrot.slane %v749_v26, 1  ;;  %v757_v32 = vrot.slane %v756_v27, 1  ;;  %v762_v33 = vrot.slane %v761_v21, 2  ;;  %v774_v36 = vrot.slane %v773_v34, 4  ;;  %v734_v38 = vpop.xlane.xlu0 %733 }
  0xff   : > { %v768_v35 = vadd.f32 %v767_v29, %v766_v25  ;;  %v780_v41 = vsel %vm679_vm0, %v734_v38, 0.0 }
 0x100   : > { %v751_v8 = vadd.f32 %v750_v31, %v749_v26  ;;  %v758_v37 = vadd.f32 %v757_v32, %v756_v27  ;;  %v763_v19 = vadd.f32 %v762_v33, %v761_v21  ;;  %v775_v40 = vadd.f32 %v774_v36, %v773_v34  ;;  %v737_v48 = vpop.xlane.xlu1 %736 }
 0x101   : > { %v769_v39 = vrot.slane %v768_v35, 2  ;;  %v781_v44 = vrot.slane %v780_v41, 4  ;;  %v787_v51 = vsel %vm679_vm0, %v737_v48, 0.0 }
 0x102   : > { %v803_v42 = vsel %vm802_vm1, %v751_v8, %v744_v28  ;;  %v764_v43 = vrot.slane %v763_v19, 1  ;;  %v776_v47 = vrot.slane %v775_v40, 2  ;;  %v788_v54 = vrot.slane %v787_v51, 4 }
 0x103   : > { %v805_v45 = vsel %vm804_vm2, %v758_v37, %v803_v42  ;;  %v770_v46 = vadd.f32 %v769_v39, %v768_v35  ;;  %v782_v50 = vadd.f32 %v781_v44, %v780_v41 }
 0x104   : > { %v765_v49 = vadd.f32 %v764_v43, %v763_v19  ;;  %v777_v53 = vadd.f32 %v776_v47, %v775_v40  ;;  %v789_v59 = vadd.f32 %v788_v54, %v787_v51 }
 0x105   : > { %v771_v52 = vrot.slane %v770_v46, 1  ;;  %v783_v56 = vrot.slane %v782_v50, 2 }
 0x106   : > { %v807_v55 = vsel %vm806_vm3, %v765_v49, %v805_v45  ;;  %v778_v58 = vrot.slane %v777_v53, 1  ;;  %v790_v63 = vrot.slane %v789_v59, 2 }
 0x107   : > { %v772_v57 = vadd.f32 %v771_v52, %v770_v46  ;;  %v784_v60 = vadd.f32 %v783_v56, %v782_v50 }
 0x108   : > { %v779_v62 = vadd.f32 %v778_v58, %v777_v53  ;;  %v791_v2 = vadd.f32 %v790_v63, %v789_v59 }
 0x109   : > { %v809_v61 = vsel %vm808_vm4, %v772_v57, %v807_v55  ;;  %v785_v0 = vrot.slane %v784_v60, 1 }
 0x10a   : > { %v811_v1 = vsel %vm810_vm5, %v779_v62, %v809_v61  ;;  %v792_v4 = vrot.slane %v791_v2, 1 }
 0x10b   : > { %v786_v3 = vadd.f32 %v785_v0, %v784_v60 }
 0x10c   : > { %v793_v6 = vadd.f32 %v792_v4, %v791_v2 }
 0x10d   : > { %v813_v5 = vsel %vm812_vm6, %v786_v3, %v811_v1 }
 0x10e   : > { %v815_v7 = vsel %vm814_vm7, %v793_v6, %v813_v5 }
 0x10f   : > { %818 = vst.msk [vmem:[%s357_s28] sm:$0xff] %vm817_vm8, %v815_v7 }
 0x122   : > { %s1015_s10 = spop %1014 }
 0x123   : > { %v690_v9 = vstv %s1015_s10 }
 0x124   : > { %692 = vst.msk [vmem:[%s344_s8] sm:$0x1] %vm691_vm9, %v690_v9 }
 0x126   : > { %s1017_s15 = spop %1016 }
 0x127   : > { %v704_v10 = vstv %s1017_s15 }
 0x128   : > { %705 = vst.msk [vmem:[%s350_s14] sm:$0x1] %vm691_vm9, %v704_v10 }
 0x129 PF: > { %s19_s23 = sadd.s32 1, %s1169_s23   ;;  %s1497_s21 = smov %s1165_s22 }
 0x12a   : > { %p16_p8 = scmp.ge.s32.totalorder %s19_s23, 4   ;;  %s1498_s22 = smov %s1500_s26 }
 0x12c   :  { %18 = sbr.rel (!%p16_p8) target bundleno = 3 (0x3), region = 118 }
 0x131   :  { %880 = vsyncpa [#allocation6], 1 }
 0x132   :  { %882 = vsyncpa [#allocation6 + $0x1], 1 }
 0x133   :  { %883 = vsyncpa [#allocation8], 1 }

</bundles_post_ra>
